<compile_context>
chip_gen: v7x
topology: tpu7x:2x2x1
jax: 0.10.0
libtpu: 0.0.40
codegen_flags: <defaults>
</compile_context>

<pallas_src>
import functools

import jax
import jax.numpy as jnp
from jax.experimental import pallas as pl
from jax.experimental.pallas import tpu as pltpu


def _actor_critic_kernel(num_actions, x_ref, w1_ref, b1_ref, w2_ref, b2_ref,
                         out_ref, path_ref):
    """Fused actor + critic MLP forward (2 MXU matmuls) + argmax epilogue.

    x_ref    : [TB, D]     f32 batch tile
    w1_ref   : [D, 2H]     fused layer-1 weights (actor || critic)
    b1_ref   : [1, 2H]     fused layer-1 bias
    w2_ref   : [2H, OUT]   block-diagonal fused layer-2 weights (OUT = 128-pad)
    b2_ref   : [1, OUT]    fused layer-2 bias (zero padded)
    out_ref  : [TB, OUT]   lane-dense output: logits in [:, :A], value in [:, A]
    path_ref : [TB, 1]     int32 greedy routing decision (argmax of logits)
    """
    x = x_ref[...]
    # Layer 1 (both heads at once): h = relu(x @ W1 + b1), shape [TB, 2H=128].
    h = jnp.dot(x, w1_ref[...],
                precision=jax.lax.Precision.HIGHEST,
                preferred_element_type=jnp.float32)
    h = jnp.maximum(h + b1_ref[...], 0.0)
    # Layer 2 (block-diagonal): out[:, :A] = actor logits, out[:, A] = value.
    out = jnp.dot(h, w2_ref[...],
                  precision=jax.lax.Precision.HIGHEST,
                  preferred_element_type=jnp.float32) + b2_ref[...]
    out_ref[...] = out.astype(out_ref.dtype)

    # Greedy routing decision ("path") in the epilogue: per-row cross-lane
    # max/argmax runs on the XLU (free slots here) and avoids a wrapper-side
    # jnp.argmax that would re-read the whole slab from HBM. The reduction is
    # across lanes only, so garbage rows of a partial last block never mix
    # into valid rows (they are dropped on writeback anyway).
    col = jax.lax.broadcasted_iota(jnp.int32, out.shape, dimension=1)
    logits = jnp.where(col < num_actions, out, -jnp.inf)
    row_max = jnp.max(logits, axis=-1, keepdims=True)
    cand = jnp.where(logits == row_max, col, jnp.int32(out.shape[-1]))
    path_ref[...] = jnp.min(cand, axis=-1, keepdims=True).astype(jnp.int32)


def fuse_params(params):
    """One-time layout plumbing: pack per-head weights into fused operands."""
    D, H = params["wa1"].shape
    A = params["wa2"].shape[1]
    # Layer 1: [D, 2H] with actor columns first, critic columns second.
    w1 = jnp.concatenate([params["wa1"], params["wc1"]], axis=1)
    b1 = jnp.concatenate([params["ba1"], params["bc1"]], axis=1)
    # Layer 2: block-diagonal, zero-padded to a full 128-lane output width.
    out_w = max(128, ((A + 1 + 127) // 128) * 128)
    assert A + 1 <= out_w, "num_devices too large for padded output width"
    w2 = jnp.zeros((2 * H, out_w), jnp.float32)
    w2 = w2.at[:H, :A].set(params["wa2"])          # actor hidden -> logits
    w2 = w2.at[H:, A].set(params["wc2"][:, 0])     # critic hidden -> value col
    b2 = jnp.zeros((1, out_w), jnp.float32)
    b2 = b2.at[0, :A].set(params["ba2"][0])
    b2 = b2.at[0, A].set(params["bc2"][0, 0])
    return {"w1": w1, "b1": b1, "w2": w2, "b2": b2, "A": A}


def _vmem_budget_bytes():
    """VMEM budget for the pipelined batch tiles (conservative across gens)."""
    # Stay under the smallest scoped-VMEM default (v5e: 16 MiB; v6e/v7x: 32 MiB)
    # and never above 1/4 of physical VMEM (v7x: 64 MiB physical).
    budget = 12 << 20
    try:
        info = pltpu.get_tpu_info()
        cap = getattr(info, "vmem_capacity_bytes", 0) or 0
        if cap:
            budget = min(budget, cap // 4)
    except Exception:
        pass
    return budget


def _choose_batch_tile(B, D, OUT, H2, requested=None):
    """Pick the batch tile from a VMEM budget, not a magic number."""
    if requested is not None:
        return max(1, min(requested, B))
    # Per-row VMEM footprint (bytes), double-buffered pipeline stages:
    #   x tiles, f32 out slab, lane-padded int32 path tiles, plus headroom for
    #   the h=[tb,128] f32 intermediate / temporaries.
    per_row = 4 * (2 * D + 2 * OUT + 2 * 128 + 2 * H2)
    budget = _vmem_budget_bytes() - (512 << 10)   # reserve: resident weights + scratch
    tb = max(256, (budget // per_row) // 256 * 256)
    tb = min(tb, 4096)
    # Guarantee >=4 grid steps for large batches so ("parallel",) shards across
    # both v7x TensorCores (and the pipeline overlaps DMA); never split tiny B.
    steps_target = -(-B // 4)
    steps_target = -(-steps_target // 256) * 256
    tb = min(tb, max(1024, steps_target))
    return min(tb, B)


def actor_critic_forward(x, fused, *, batch_tile=None, out_dtype=jnp.float32):
    """Pallas wrapper mirroring ActorCritic.forward: returns (p, path, devices, v)."""
    B, D = x.shape
    A = fused["A"]
    w1, b1, w2, b2 = fused["w1"], fused["b1"], fused["w2"], fused["b2"]
    H2 = w1.shape[1]       # fused hidden width (2H)
    OUT = w2.shape[1]      # lane-dense padded output width (multiple of 128)

    tb = _choose_batch_tile(B, D, OUT, H2, requested=batch_tile)
    grid = (pl.cdiv(B, tb),)

    out_itemsize = jnp.dtype(out_dtype).itemsize
    cost = pl.CostEstimate(
        flops=2 * B * (D * H2 + H2 * OUT),
        transcendentals=0,
        bytes_accessed=(4 * (B * D + D * H2 + H2 + H2 * OUT + OUT)
                        + out_itemsize * B * OUT + 4 * B),
    )

    out, path = pl.pallas_call(
        functools.partial(_actor_critic_kernel, A),
        out_shape=(jax.ShapeDtypeStruct((B, OUT), out_dtype),
                   jax.ShapeDtypeStruct((B, 1), jnp.int32)),
        grid_spec=pltpu.PrefetchScalarGridSpec(
            num_scalar_prefetch=0,
            grid=grid,
            in_specs=[
                pl.BlockSpec((tb, D), lambda i: (i, 0)),     # x: tiled over batch
                pl.BlockSpec((D, H2), lambda i: (0, 0)),     # weights stay resident
                pl.BlockSpec((1, H2), lambda i: (0, 0)),
                pl.BlockSpec((H2, OUT), lambda i: (0, 0)),
                pl.BlockSpec((1, OUT), lambda i: (0, 0)),
            ],
            out_specs=[
                pl.BlockSpec((tb, OUT), lambda i: (i, 0)),   # lane-dense slab
                pl.BlockSpec((tb, 1), lambda i: (i, 0)),     # int32 routing decision
            ],
        ),
        compiler_params=pltpu.CompilerParams(
            dimension_semantics=("parallel",)),
        cost_estimate=cost,
    )(x, w1, b1, w2, b2)

    # Layout plumbing only: slice logits / value out of the padded slab. If a
    # downstream consumer can take the padded slab directly, return `out`
    # itself and skip these slices to avoid re-reading the slab.
    p = out[:, :A]
    v = out[:, A:A + 1]
    path = path[:, 0]
    devices = None   # actor is not a ClusTree in this synthetic setup
    return p, path, devices, v


def init_params(key, state_dim, hidden_dim, num_devices):
    ks = jax.random.split(key, 8)
    s = lambda fan_in: 1.0 / jnp.sqrt(jnp.float32(fan_in))
    return {
        "wa1": jax.random.uniform(ks[0], (state_dim, hidden_dim), jnp.float32,
                                  -s(state_dim), s(state_dim)),
        "ba1": jax.random.uniform(ks[1], (1, hidden_dim), jnp.float32,
                                  -s(state_dim), s(state_dim)),
        "wa2": jax.random.uniform(ks[2], (hidden_dim, num_devices), jnp.float32,
                                  -s(hidden_dim), s(hidden_dim)),
        "ba2": jax.random.uniform(ks[3], (1, num_devices), jnp.float32,
                                  -s(hidden_dim), s(hidden_dim)),
        "wc1": jax.random.uniform(ks[4], (state_dim, hidden_dim), jnp.float32,
                                  -s(state_dim), s(state_dim)),
        "bc1": jax.random.uniform(ks[5], (1, hidden_dim), jnp.float32,
                                  -s(state_dim), s(state_dim)),
        "wc2": jax.random.uniform(ks[6], (hidden_dim, 1), jnp.float32,
                                  -s(hidden_dim), s(hidden_dim)),
        "bc2": jax.random.uniform(ks[7], (1, 1), jnp.float32,
                                  -s(hidden_dim), s(hidden_dim)),
    }


def _reference(x, params):
    h_a = jnp.maximum(x @ params["wa1"] + params["ba1"], 0.0)
    p = h_a @ params["wa2"] + params["ba2"]
    h_c = jnp.maximum(x @ params["wc1"] + params["bc1"], 0.0)
    v = h_c @ params["wc2"] + params["bc2"]
    return p, v


if __name__ == "__main__":
    key = jax.random.PRNGKey(0)
    k_param, k_x = jax.random.split(key)

    B, D, H, A = 8, 32, 64, 8  # batch, state_dim, hidden (2H=128), num_devices
    params = init_params(k_param, D, H, A)
    fused = fuse_params(params)
    x = jax.random.normal(k_x, (B, D), dtype=jnp.float32)

    p, path, devices, v = actor_critic_forward(x, fused)
    jax.block_until_ready((p, path, v))

    p_ref, v_ref = _reference(x, params)
    assert jnp.allclose(p, p_ref, atol=1e-5, rtol=1e-5)
    assert jnp.allclose(v, v_ref, atol=1e-5, rtol=1e-5)
    assert jnp.array_equal(path, jnp.argmax(p, axis=-1).astype(jnp.int32))
    assert p.shape == (B, A) and v.shape == (B, 1) and path.shape == (B,)
    assert devices is None

    print("KERNEL_OK")
</pallas_src>

<mosaic_0001>
module attributes {stable_mosaic.version = 11 : i64} {
  func.func @_actor_critic_kernel(%arg0: i32, %arg1: memref<8x32xf32, #tpu.memory_space<vmem>>, %arg2: memref<32x128xf32, #tpu.memory_space<vmem>>, %arg3: memref<1x128xf32, #tpu.memory_space<vmem>>, %arg4: memref<128x128xf32, #tpu.memory_space<vmem>>, %arg5: memref<1x128xf32, #tpu.memory_space<vmem>>, %arg6: memref<8x128xf32, #tpu.memory_space<vmem>>, %arg7: memref<8x1xi32, #tpu.memory_space<vmem>>) attributes {dimension_semantics = [#tpu.dimension_semantics<parallel>], iteration_bounds = array<i64: 1>, scalar_prefetch = 0 : i64, scratch_operands = 0 : i64, tpu.core_type = #tpu.core_type<tc>, window_params = [{transform_indices = @transform_0, window_bounds = array<i64: 8, 32>}, {pipeline_mode = #tpu.pipeline_mode<synchronous>, transform_indices = @transform_1, window_bounds = array<i64: 32, 128>}, {pipeline_mode = #tpu.pipeline_mode<synchronous>, transform_indices = @transform_2, window_bounds = array<i64: 1, 128>}, {pipeline_mode = #tpu.pipeline_mode<synchronous>, transform_indices = @transform_3, window_bounds = array<i64: 128, 128>}, {pipeline_mode = #tpu.pipeline_mode<synchronous>, transform_indices = @transform_4, window_bounds = array<i64: 1, 128>}, {transform_indices = @transform_5, window_bounds = array<i64: 8, 128>}, {transform_indices = @transform_6, window_bounds = array<i64: 8, 1>}]} {
    %c0 = arith.constant 0 : index
    %c0_0 = arith.constant 0 : index
    %0 = vector.load %arg1[%c0, %c0_0] : memref<8x32xf32, #tpu.memory_space<vmem>>, vector<8x32xf32>
    %c0_1 = arith.constant 0 : index
    %c0_2 = arith.constant 0 : index
    %1 = vector.load %arg2[%c0_1, %c0_2] : memref<32x128xf32, #tpu.memory_space<vmem>>, vector<32x128xf32>
    %cst = arith.constant dense<0.000000e+00> : vector<8x128xf32>
    %2 = tpu.matmul %0, %1, %cst {dimension_numbers = #tpu.dot_dimension_numbers<[1], [0], [0], [1], [0, 0, 1, 1], [], []>, precision = #tpu.contract_precision<fp32>} : vector<8x32xf32>, vector<32x128xf32>, vector<8x128xf32> -> vector<8x128xf32>
    %c0_3 = arith.constant 0 : index
    %c0_4 = arith.constant 0 : index
    %3 = vector.load %arg3[%c0_3, %c0_4] : memref<1x128xf32, #tpu.memory_space<vmem>>, vector<1x128xf32>
    %4 = vector.broadcast %3 : vector<1x128xf32> to vector<8x128xf32>
    %5 = arith.addf %2, %4 : vector<8x128xf32>
    %cst_5 = arith.constant 0.000000e+00 : f32
    %6 = vector.broadcast %cst_5 : f32 to vector<8x128xf32>
    %7 = arith.maximumf %5, %6 : vector<8x128xf32>
    %c0_6 = arith.constant 0 : index
    %c0_7 = arith.constant 0 : index
    %8 = vector.load %arg4[%c0_6, %c0_7] : memref<128x128xf32, #tpu.memory_space<vmem>>, vector<128x128xf32>
    %cst_8 = arith.constant dense<0.000000e+00> : vector<8x128xf32>
    %9 = tpu.matmul %7, %8, %cst_8 {dimension_numbers = #tpu.dot_dimension_numbers<[1], [0], [0], [1], [0, 0, 1, 1], [], []>, precision = #tpu.contract_precision<fp32>} : vector<8x128xf32>, vector<128x128xf32>, vector<8x128xf32> -> vector<8x128xf32>
    %c0_9 = arith.constant 0 : index
    %c0_10 = arith.constant 0 : index
    %10 = vector.load %arg5[%c0_9, %c0_10] : memref<1x128xf32, #tpu.memory_space<vmem>>, vector<1x128xf32>
    %11 = vector.broadcast %10 : vector<1x128xf32> to vector<8x128xf32>
    %12 = arith.addf %9, %11 : vector<8x128xf32>
    %c0_11 = arith.constant 0 : index
    %c0_12 = arith.constant 0 : index
    %13 = vector.load %arg6[%c0_11, %c0_12] : memref<8x128xf32, #tpu.memory_space<vmem>>, vector<8x128xf32>
    tpu.vector_store %arg6[%c0_11, %c0_12], %12 {strides = array<i32>} : memref<8x128xf32, #tpu.memory_space<vmem>>, vector<8x128xf32>,
    %14 = tpu.iota {dimensions = array<i32: 1>} : vector<8x128xi32>
    %c8_i32 = arith.constant 8 : i32
    %15 = vector.broadcast %c8_i32 : i32 to vector<8x128xi32>
    %16 = arith.cmpi slt, %14, %15 : vector<8x128xi32>
    %cst_13 = arith.constant 0xFF800000 : f32
    %17 = vector.broadcast %cst_13 : f32 to vector<8x128xf32>
    %18 = arith.select %16, %12, %17 : vector<8x128xi1>, vector<8x128xf32>
    %cst_14 = arith.constant dense<0xFF800000> : vector<8xf32>
    %19 = vector.multi_reduction <maximumf>, %18, %cst_14 [1] : vector<8x128xf32> to vector<8xf32>
    %20 = vector.shape_cast %19 : vector<8xf32> to vector<8x1xf32>
    %21 = vector.broadcast %20 : vector<8x1xf32> to vector<8x128xf32>
    %22 = arith.cmpf oeq, %18, %21 : vector<8x128xf32>
    %c128_i32 = arith.constant 128 : i32
    %23 = vector.broadcast %c128_i32 : i32 to vector<8x128xi32>
    %24 = arith.select %22, %14, %23 : vector<8x128xi1>, vector<8x128xi32>
    %cst_15 = arith.constant dense<2147483647> : vector<8xi32>
    %25 = vector.multi_reduction <minsi>, %24, %cst_15 [1] : vector<8x128xi32> to vector<8xi32>
    %26 = vector.shape_cast %25 : vector<8xi32> to vector<8x1xi32>
    %c0_16 = arith.constant 0 : index
    %c0_17 = arith.constant 0 : index
    %27 = vector.load %arg7[%c0_16, %c0_17] : memref<8x1xi32, #tpu.memory_space<vmem>>, vector<8x1xi32>
    tpu.vector_store %arg7[%c0_16, %c0_17], %26 {strides = array<i32>} : memref<8x1xi32, #tpu.memory_space<vmem>>, vector<8x1xi32>,
    return
  }
  func.func @transform_0(%arg0: i32) -> (i32, i32) {
    %c0_i32 = arith.constant 0 : i32
    %c0_i32_0 = arith.constant 0 : i32
    return %arg0, %c0_i32 : i32, i32
  }
  func.func @transform_1(%arg0: i32) -> (i32, i32) {
    %c0_i32 = arith.constant 0 : i32
    %c0_i32_0 = arith.constant 0 : i32
    %c0_i32_1 = arith.constant 0 : i32
    return %c0_i32, %c0_i32_0 : i32, i32
  }
  func.func @transform_2(%arg0: i32) -> (i32, i32) {
    %c0_i32 = arith.constant 0 : i32
    %c0_i32_0 = arith.constant 0 : i32
    %c0_i32_1 = arith.constant 0 : i32
    return %c0_i32, %c0_i32_0 : i32, i32
  }
  func.func @transform_3(%arg0: i32) -> (i32, i32) {
    %c0_i32 = arith.constant 0 : i32
    %c0_i32_0 = arith.constant 0 : i32
    %c0_i32_1 = arith.constant 0 : i32
    return %c0_i32, %c0_i32_0 : i32, i32
  }
  func.func @transform_4(%arg0: i32) -> (i32, i32) {
    %c0_i32 = arith.constant 0 : i32
    %c0_i32_0 = arith.constant 0 : i32
    %c0_i32_1 = arith.constant 0 : i32
    return %c0_i32, %c0_i32_0 : i32, i32
  }
  func.func @transform_5(%arg0: i32) -> (i32, i32) {
    %c0_i32 = arith.constant 0 : i32
    %c0_i32_0 = arith.constant 0 : i32
    return %arg0, %c0_i32 : i32, i32
  }
  func.func @transform_6(%arg0: i32) -> (i32, i32) {
    %c0_i32 = arith.constant 0 : i32
    %c0_i32_0 = arith.constant 0 : i32
    return %arg0, %c0_i32 : i32, i32
  }
}

</mosaic_0001>

<bundles_post_ra>
// kernel: tpu_custom_call.1
= control target key start
LH: loop header
LB: loop body
LE: loop exit
PB: predicated region body
PF: predicated region fallthrough
CT: control target
= control target key end

     0   :  { %12 = vsyncpa [#allocation3], 0  ;;  %s2494_s0 = inlined_call_operand.hbm [shape: f32[8,32], index: 0, kind: input, shape index: {}]   ;;  %s2495_s1 = inlined_call_operand.hbm [shape: f32[32,128], index: 1, kind: input, shape index: {}]   ;;  %s2496_s2 = inlined_call_operand.vmem [shape: f32[1,128], index: 2, kind: input, shape index: {}]   ;;  %s2497_s3 = inlined_call_operand.hbm [shape: f32[128,128], index: 3, kind: input, shape index: {}]   ;;  %s2498_s4 = inlined_call_operand.vmem [shape: f32[1,128], index: 4, kind: input, shape index: {}]   ;;  %s2499_s5 = inlined_call_operand.hbm [shape: f32[8,128], index: 5, kind: output, shape index: {0}]   ;;  %s2500_s6 = inlined_call_operand.vmem [shape: s32[8,1], index: 6, kind: output, shape index: {1}]  }
   0x1   :  { %13 = vsyncpa [#allocation6], 0 }
   0x2   :  { %14 = vsyncpa [#allocation4], 0  ;;  %s1987_s21 = smov [#allocation5]   ;;  %s1893_s25 = scalar_lea.hbm %s2495_s1, 512 }
   0x3   :  { %s30_s22 = sshll.u32 %s1987_s21, 4  ;;  %p1894_p0 = scmp.ne.s32.totalorder %s2495_s1, %s1893_s25  ;;  %s31_s22 = int_to_ptr.vmem [resolvable:$true] %s30_s22 }
   0x4   :  { %p1897_p1 = scmp.lt.u32.totalorder %s1893_s25, %s2495_s1 }
   0x6   :  { %p1899_p2 = pnand %p1897_p1, %p1894_p0 }
   0x8   :  { %1902 = shalt.err (!%p1899_p2)
}
   0x9   :  { %s1903_s30 = scalar_lea.vmem %s31_s22, 512  ;;  %p1908_p4 = scmp.lt.s32.totalorder %s31_s22, %s31_s22 }
   0xa   :  { %p1904_p3 = scmp.ne.s32.totalorder %s31_s22, %s1903_s30  ;;  %p1909_p5 = scmp.lt.s32.totalorder %s1903_s30, %s1903_s30 }
   0xc   :  { %p1910_p6 = por %p1909_p5, %p1908_p4 }
   0xe   :  { %p1911_p7 = pnand %p1910_p6, %p1904_p3 }
  0x10   :  { %1914 = shalt.err (!%p1911_p7)
}
  0x11   :  { %s1988_s7 = smov 128   ;;  %s1989_s8 = smov 8  }
  0x12   :  { %36 = dma.hbm_to_vmem [thread:$0]  %s2495_s1, 512, %s31_s22, [#allocation6], %s1988_s7, %s1988_s7, %s1989_s8  }
  0x13   :  { %s1990_s11 = smov [#allocation2]   ;;  %s1991_s13 = smov [#allocation7]  }
  0x14   :  { %s21_s12 = sshll.u32 %s1990_s11, 4  ;;  %s44_s14 = sshll.u32 %s1991_s13, 4  ;;  %s22_s12 = int_to_ptr.vmem [resolvable:$true] %s21_s12  ;;  %s45_s14 = int_to_ptr.vmem [resolvable:$true] %s44_s14 }
  0x15   :  { %s1915_s17 = scalar_lea.hbm %s2494_s0, 128 }
  0x16   :  { %p1916_p8 = scmp.ne.s32.totalorder %s2494_s0, %s1915_s17  ;;  %p1919_p9 = scmp.lt.u32.totalorder %s1915_s17, %s2494_s0 }
  0x18   :  { %p1921_p10 = pnand %p1919_p9, %p1916_p8 }
  0x1a   :  { %1924 = shalt.err (!%p1921_p10)
}
  0x1b   :  { %s1925_s1 = scalar_lea.vmem %s22_s12, 128  ;;  %p1930_p12 = scmp.lt.s32.totalorder %s22_s12, %s22_s12 }
  0x1c   :  { %p1926_p11 = scmp.ne.s32.totalorder %s22_s12, %s1925_s1  ;;  %p1931_p13 = scmp.lt.s32.totalorder %s1925_s1, %s1925_s1 }
  0x1e   :  { %p1932_p0 = por %p1931_p13, %p1930_p12 }
  0x20   :  { %p1933_p1 = pnand %p1932_p0, %p1926_p11 }
  0x22   :  { %1936 = shalt.err (!%p1933_p1)
}
  0x23   :  { %24 = dma.hbm_to_vmem [thread:$0]  %s2494_s0, 128, %s22_s12, [#allocation3]  }
  0x24   :  { %s1937_s26 = scalar_lea.hbm %s2497_s3, 2048 }
  0x25   :  { %p1938_p2 = scmp.ne.s32.totalorder %s2497_s3, %s1937_s26  ;;  %p1941_p3 = scmp.lt.u32.totalorder %s1937_s26, %s2497_s3 }
  0x27   :  { %p1943_p4 = pnand %p1941_p3, %p1938_p2 }
  0x29   :  { %1946 = shalt.err (!%p1943_p4)
}
  0x2a   :  { %s1947_s9 = scalar_lea.vmem %s45_s14, 2048  ;;  %p1952_p6 = scmp.lt.s32.totalorder %s45_s14, %s45_s14 }
  0x2b   :  { %p1948_p5 = scmp.ne.s32.totalorder %s45_s14, %s1947_s9  ;;  %p1953_p7 = scmp.lt.s32.totalorder %s1947_s9, %s1947_s9 }
  0x2d   :  { %p1954_p8 = por %p1953_p7, %p1952_p6 }
  0x2f   :  { %p1955_p9 = pnand %p1954_p8, %p1948_p5 }
  0x31   :  { %1958 = shalt.err (!%p1955_p9)
}
  0x32   :  { %50 = dma.hbm_to_vmem [thread:$0]  %s2497_s3, 2048, %s45_s14, [#allocation6], %s1988_s7, %s1988_s7, %s1989_s8  }
  0x33   :  { %1981 = dma.done.wait [#allocation3], 128  }
  0x34   :  { %1982 = vsyncadd [#allocation3], 4294967168 }
  0x35   :  { %1983 = dma.done.wait [#allocation6], 2560  }
  0x36   :  { %1984 = vsyncadd [#allocation6], 4294964736  ;;  %v1992_v0 = vmov 0.0|0.0   ;;  %vm1993_vm0 = vmmov 0   ;;  %v1994_v1 = vmov 0.0   ;;  %vm74_vm1 = vcmask 261120  }
  0x37   :  { %1683 = vmatprep.subr.bf16.mxu0 %v1992_v0  ;;  %1415 = vmatprep.mubr.msk.f32.mxu0 %vm1993_vm0, %v1994_v1  ;;  %v63_v2 = vld [vmem:[#allocation5] sm:$0xff]  ;;  %v64_v3 = vld [vmem:[#allocation5 + $0x8] sm:$0xff]  ;;  %v65_v4 = vld [vmem:[#allocation5 + $0x10] sm:$0xff] }
  0x38   :  { %1767 = vmatprep.subr.bf16.mxu1 %v1992_v0  ;;  %1575 = vmatprep.mubr.msk.f32.mxu1 %vm1993_vm0, %v1994_v1  ;;  %v79_v5 = vand.u32 4294901760, %v63_v2  ;;  %v82_v6 = vand.u32 4294901760, %v64_v3  ;;  %v66_v7 = vld [vmem:[#allocation5 + $0x18] sm:$0xff]  ;;  %v85_v8 = vand.u32 4294901760, %v65_v4  ;;  %v2079_v10 = vld [vmem:[#allocation7] sm:$0xff]  ;;  %v2081_v13 = vld [vmem:[#allocation7 + $0x8] sm:$0xff] }
  0x39   :  { %v62_v9 = vld [vmem:[#allocation2] sm:$0xff]  ;;  %v88_v11 = vand.u32 4294901760, %v66_v7  ;;  %v588_v14 = vand.u32 4294901760, %v2079_v10  ;;  %v591_v25 = vand.u32 4294901760, %v2081_v13  ;;  %v2122_v32 = vld [vmem:[#allocation7 + $0x10] sm:$0xff]  ;;  %v2142_v42 = vld [vmem:[#allocation7 + $0x20] sm:$0xff] }
  0x3a   :  { %v76_v12 = vsel %vm74_vm1, %v62_v9, 0  ;;  %v2084_v15 = vpack.c.bf16 %v82_v6, %v79_v5  ;;  %v2086_v16 = vsub.f32 %v63_v2, %v79_v5  ;;  %v2088_v17 = vsub.f32 %v64_v3, %v82_v6  ;;  %v2124_v33 = vld [vmem:[#allocation7 + $0x18] sm:$0xff]  ;;  %v2144_v43 = vld [vmem:[#allocation7 + $0x28] sm:$0xff]  ;;  %v2146_v44 = vld [vmem:[#allocation7 + $0x30] sm:$0xff] }
  0x3b   :  { %v2090_v18 = vsub.f32 %v65_v4, %v85_v8  ;;  %v2092_v19 = vpack.c.bf16 %v88_v11, %v85_v8  ;;  %v2094_v20 = vsub.f32 %v66_v7, %v88_v11  ;;  %v2096_v21 = vand.u32 4294901760, %v76_v12  ;;  %v2150_v49 = vld [vmem:[#allocation7 + $0x38] sm:$0xff]  ;;  %v2165_v56 = vld [vmem:[#allocation7 + $0x40] sm:$0xff]  ;;  %v2171_v59 = vld [vmem:[#allocation7 + $0x48] sm:$0xff] }
  0x3c   :  { %1685 = vmatpush3.bf16.msra.mxu0 %v2084_v15  ;;  %v160_v22 = vand.u32 4294901760, %v2086_v16  ;;  %v167_v23 = vand.u32 4294901760, %v2088_v17  ;;  %v2120_v31 = vsub.f32 %v2079_v10, %v588_v14  ;;  %v2134_v38 = vsub.f32 %v2081_v13, %v591_v25  ;;  %v2200_v6 = vld [vmem:[#allocation7 + $0x50] sm:$0xff]  ;;  %v2203_v7 = vld [vmem:[#allocation7 + $0x58] sm:$0xff] }
  0x3d   :  { %v174_v24 = vand.u32 4294901760, %v2090_v18  ;;  %1686 = vmatprep.subr.bf16.mxu0 %v1992_v0  ;;  %v2105_v26 = vsub.f32 %v76_v12, %v2096_v21  ;;  %v181_v27 = vand.u32 4294901760, %v2094_v20  ;;  %v594_v40 = vand.u32 4294901760, %v2122_v32 }
  0x3e   :  { %v161_v28 = vsub.f32 %v2086_v16, %v160_v22  ;;  %v168_v29 = vsub.f32 %v2088_v17, %v167_v23  ;;  %v597_v41 = vand.u32 4294901760, %v2124_v33  ;;  %v1768_v48 = vpack.c.bf16 %v2134_v38, %v2120_v31 }
  0x3f   :  { %v175_v30 = vsub.f32 %v2090_v18, %v174_v24  ;;  %v149_v34 = vand.u32 4294901760, %v2105_v26  ;;  %v182_v35 = vsub.f32 %v2094_v20, %v181_v27  ;;  %v2155_v51 = vsub.f32 %v2122_v32, %v594_v40 }
  0x40   :  { %1688 = vmatpush3.bf16.msra.mxu0 %v2092_v19  ;;  %v162_v36 = vand.u32 4294901760, %v161_v28  ;;  %v169_v37 = vand.u32 4294901760, %v168_v29  ;;  %v2160_v52 = vsub.f32 %v2124_v33, %v597_v41  ;;  %1769 = vmatpush3.bf16.msra.mxu1 %v1768_v48  ;;  %v600_v53 = vand.u32 4294901760, %v2142_v42 }
  0x41   :  { %v150_v39 = vsub.f32 %v2105_v26, %v149_v34  ;;  %1689 = vmatprep.subr.bf16.mxu0 %v1992_v0  ;;  %v176_v46 = vand.u32 4294901760, %v175_v30  ;;  %v183_v47 = vand.u32 4294901760, %v182_v35  ;;  %v603_v54 = vand.u32 4294901760, %v2144_v43  ;;  %1770 = vmatprep.subr.bf16.mxu1 %v1992_v0 }
  0x42   :  { %v1690_v45 = vpack.c.bf16 %v169_v37, %v162_v36  ;;  %v606_v55 = vand.u32 4294901760, %v2146_v44  ;;  %v1771_v57 = vpack.c.bf16 %v2160_v52, %v2155_v51  ;;  %v609_v58 = vand.u32 4294901760, %v2150_v49 }
  0x43   :  { %v151_v50 = vand.u32 4294901760, %v150_v39  ;;  %v1693_v60 = vpack.c.bf16 %v183_v47, %v176_v46  ;;  %v2178_v61 = vsub.f32 %v2142_v42, %v600_v53  ;;  %v2183_v62 = vsub.f32 %v2144_v43, %v603_v54 }
  0x44   :  { %v612_v63 = vand.u32 4294901760, %v2165_v56  ;;  %1772 = vmatpush3.bf16.msra.mxu1 %v1771_v57  ;;  %v2192_v3 = vsub.f32 %v2146_v44, %v606_v55  ;;  %v2197_v4 = vsub.f32 %v2150_v49, %v609_v58  ;;  %v615_v5 = vand.u32 4294901760, %v2171_v59 }
  0x45   :  { %1416 = vmatmul.mubr.f32.vlgmr.msra.gmra.mrb[0].mxu0 %v151_v50  ;;  %v1774_v2 = vpack.c.bf16 %v2183_v62, %v2178_v61  ;;  %1773 = vmatprep.subr.bf16.mxu1 %v1992_v0  ;;  %v1696_v8 = vpack.c.bf16 %v2088_v17, %v2086_v16  ;;  %v618_v9 = vand.u32 4294901760, %v2200_v6  ;;  %v621_v29 = vand.u32 4294901760, %v2203_v7  ;;  %v576_v17 = vld [vmem:[#allocation7 + $0x60] sm:$0xff] }
  0x46   :  { %1691 = vmatpush3.bf16.msra.mxu0 %v1690_v45  ;;  %1426 = vmatprep.mubr.msk.f32.mxu0 %vm1993_vm0, %v1994_v1  ;;  %v1777_v11 = vpack.c.bf16 %v2197_v4, %v2192_v3  ;;  %v2214_v12 = vsub.f32 %v2165_v56, %v612_v63  ;;  %v2219_v28 = vsub.f32 %v2171_v59, %v615_v5 }
  0x47   :  { %1692 = vmatprep.subr.bf16.mxu0 %v1992_v0  ;;  %v1699_v30 = vpack.c.bf16 %v2094_v20, %v2090_v18  ;;  %v2234_v36 = vsub.f32 %v2200_v6, %v618_v9  ;;  %v2239_v37 = vsub.f32 %v2203_v7, %v621_v29  ;;  %v1708_v45 = vpack.c.bf16 %v167_v23, %v160_v22  ;;  %v577_v18 = vld [vmem:[#allocation7 + $0x68] sm:$0xff]  ;;  %v578_v23 = vld [vmem:[#allocation7 + $0x70] sm:$0xff] }
  0x48   :  { %1775 = vmatpush3.bf16.msra.mxu1 %v1774_v2  ;;  %v1780_v35 = vpack.c.bf16 %v2219_v28, %v2214_v12  ;;  %v1711_v46 = vpack.c.bf16 %v181_v27, %v174_v24  ;;  %v2278_v16 = vpack.c.bf16 %v591_v25, %v588_v14  ;;  %v2297_v10 = vpack.c.bf16 %v603_v54, %v600_v53  ;;  %v579_v24 = vld [vmem:[#allocation7 + $0x78] sm:$0xff] }
  0x49   :  { %1776 = vmatprep.subr.bf16.mxu1 %v1992_v0  ;;  %v1783_v39 = vpack.c.bf16 %v2239_v37, %v2234_v36  ;;  %v2305_v13 = vpack.c.bf16 %v609_v58, %v606_v55  ;;  %v2313_v14 = vpack.c.bf16 %v615_v5, %v612_v63  ;;  %v627_v20 = vand.u32 4294901760, %v577_v18  ;;  %v1273_v5 = vld [vmem:[%s2496_s2] ss:$0 sm:$0xff] }
  0x4a   :  { %1694 = vmatpush3.bf16.msra.mxu0 %v1693_v60  ;;  %v633_v27 = vand.u32 4294901760, %v579_v24  ;;  %v2322_v32 = vpack.c.bf16 %v621_v29, %v618_v9  ;;  %v681_v6 = vand.u32 4294901760, %v2120_v31  ;;  %v688_v7 = vand.u32 4294901760, %v2134_v38 }
  0x4b   :  { %1695 = vmatprep.subr.bf16.mxu0 %v1992_v0  ;;  %v771_v22 = vsub.f32 %v577_v18, %v627_v20 }
  0x4c   :  { %1778 = vmatpush3.bf16.msra.mxu1 %v1777_v11 }
  0x4d   :  { %1427 = vmatmul.mubr.f32.vlgmr.msra.gmra.mrb[0].mxu0 %v2096_v21  ;;  %1779 = vmatprep.subr.bf16.mxu1 %v1992_v0  ;;  %v772_v44 = vand.u32 4294901760, %v771_v22 }
  0x4e   :  { %1697 = vmatpush3.bf16.msra.mxu0 %v1696_v8  ;;  %1437 = vmatprep.mubr.msk.f32.mxu0 %vm1993_vm0, %v1994_v1 }
  0x4f   :  { %1698 = vmatprep.subr.bf16.mxu0 %v1992_v0  ;;  %v773_v48 = vsub.f32 %v771_v22, %v772_v44 }
  0x50   :  { %1781 = vmatpush3.bf16.msra.mxu1 %v1780_v35  ;;  %v689_v35 = vsub.f32 %v2134_v38, %v688_v7 }
  0x51   :  { %1782 = vmatprep.subr.bf16.mxu1 %v1992_v0  ;;  %v774_v50 = vand.u32 4294901760, %v773_v48 }
  0x52   :  { %1700 = vmatpush3.bf16.msra.mxu0 %v1699_v30  ;;  %v682_v30 = vsub.f32 %v2120_v31, %v681_v6 }
  0x53   :  { %1701 = vmatprep.subr.bf16.mxu0 %v1992_v0 }
  0x54   :  { %1784 = vmatpush3.bf16.msra.mxu1 %v1783_v39  ;;  %v695_v39 = vand.u32 4294901760, %v2155_v51 }
  0x55   :  { %1438 = vmatmul.mubr.f32.vlgmr.msra.gmra.mrb[0].mxu0 %v2105_v26  ;;  %1785 = vmatprep.subr.bf16.mxu1 %v1992_v0  ;;  %v630_v26 = vand.u32 4294901760, %v578_v23 }
  0x56   :  { %1703 = vmatpush3.bf16.msra.mxu0 %v2084_v15  ;;  %1448 = vmatprep.mubr.msk.f32.mxu0 %vm1993_vm0, %v1994_v1 }
  0x57   :  { %1704 = vmatprep.subr.bf16.mxu0 %v1992_v0  ;;  %v778_v33 = vsub.f32 %v578_v23, %v630_v26  ;;  %v2332_v42 = vpack.c.bf16 %v633_v27, %v630_v26 }
  0x59   :  { %v779_v53 = vand.u32 4294901760, %v778_v33 }
  0x5a   :  { %1706 = vmatpush3.bf16.msra.mxu0 %v2092_v19 }
  0x5b   :  { %1707 = vmatprep.subr.bf16.mxu0 %v1992_v0  ;;  %v780_v56 = vsub.f32 %v778_v33, %v779_v53 }
  0x5d   :  { %1449 = vmatmul.mubr.f32.vlgmr.msra.gmra.mrb[0].mxu0 %v149_v34  ;;  %v785_v34 = vsub.f32 %v579_v24, %v633_v27  ;;  %v781_v58 = vand.u32 4294901760, %v780_v56  ;;  %v737_v56 = vand.u32 4294901760, %v2214_v12 }
  0x5e   :  { %1709 = vmatpush3.bf16.msra.mxu0 %v1708_v45  ;;  %1459 = vmatprep.mubr.msk.f32.mxu0 %vm1993_vm0, %v1994_v1  ;;  %v702_v45 = vand.u32 4294901760, %v2160_v52 }
  0x5f   :  { %1710 = vmatprep.subr.bf16.mxu0 %v1992_v0  ;;  %v786_v54 = vand.u32 4294901760, %v785_v34 }
  0x60   :  { %v703_v23 = vsub.f32 %v2160_v52, %v702_v45 }
  0x61   :  { %v787_v57 = vsub.f32 %v785_v34, %v786_v54  ;;  %v2342_v2 = vpack.c.bf16 %v786_v54, %v779_v53 }
  0x62   :  { %1712 = vmatpush3.bf16.msra.mxu0 %v1711_v46 }
  0x63   :  { %1713 = vmatprep.subr.bf16.mxu0 %v1992_v0  ;;  %v788_v59 = vand.u32 4294901760, %v787_v57  ;;  %v744_v57 = vand.u32 4294901760, %v2219_v28 }
  0x65   :  { %1460 = vmatmul.mubr.f32.vlgmr.msra.gmra.mrb[0].mxu0 %v2096_v21  ;;  %v2338_v60 = vpack.c.bf16 %v788_v59, %v781_v58 }
  0x66   :  { %1715 = vmatpush3.bf16.msra.mxu0 %v2084_v15  ;;  %1470 = vmatprep.mubr.msk.f32.mxu0 %vm1993_vm0, %v1994_v1  ;;  %v2287_v15 = vpack.c.bf16 %v597_v41, %v594_v40  ;;  %v1789_v40 = vpack.c.bf16 %v785_v34, %v778_v33  ;;  %v723_v33 = vand.u32 4294901760, %v2192_v3  ;;  %v730_v34 = vand.u32 4294901760, %v2197_v4 }
  0x67   :  { %1716 = vmatprep.subr.bf16.mxu0 %v1992_v0 }
  0x68   :  { %v731_v53 = vsub.f32 %v2197_v4, %v730_v34  ;;  %v1825_v38 = vpack.c.bf16 %v730_v34, %v723_v33 }
  0x6a   :  { %1718 = vmatpush3.bf16.msra.mxu0 %v2092_v19  ;;  %v624_v19 = vand.u32 4294901760, %v576_v17 }
  0x6b   :  { %1719 = vmatprep.subr.bf16.mxu0 %v1992_v0 }
  0x6c   :  { %v2327_v41 = vpack.c.bf16 %v627_v20, %v624_v19  ;;  %v683_v20 = vand.u32 4294901760, %v682_v30 }
  0x6d   :  { %1471 = vmatmul.mubr.f32.vlgmr.msra.gmra.mrb[0].mxu0 %v2096_v21  ;;  %v764_v21 = vsub.f32 %v576_v17, %v624_v19  ;;  %v709_v17 = vand.u32 4294901760, %v2178_v61  ;;  %v716_v19 = vand.u32 4294901760, %v2183_v62 }
  0x6e   :  { %1721 = vmatpush3.bf16.msra.mxu0 %v2278_v16  ;;  %1505 = vmatprep.mubr.msk.f32.mxu0 %vm1993_vm0, %v1994_v1 }
  0x6f   :  { %1722 = vmatprep.subr.bf16.mxu0 %v1992_v0  ;;  %v1786_v25 = vpack.c.bf16 %v771_v22, %v764_v21  ;;  %v765_v43 = vand.u32 4294901760, %v764_v21  ;;  %v696_v22 = vsub.f32 %v2155_v51, %v695_v39  ;;  %v717_v27 = vsub.f32 %v2183_v62, %v716_v19 }
  0x70   :  { %v1822_v31 = vpack.c.bf16 %v716_v19, %v709_v17  ;;  %v1828_v51 = vpack.c.bf16 %v744_v57, %v737_v56  ;;  %v1229_v62 = vlaneseq }
  0x71   :  { %1787 = vmatpush3.bf16.msra.mxu1 %v1786_v25  ;;  %v766_v47 = vsub.f32 %v764_v21, %v765_v43  ;;  %v2340_v63 = vpack.c.bf16 %v772_v44, %v765_v43  ;;  %v690_v21 = vand.u32 4294901760, %v689_v35  ;;  %v710_v25 = vsub.f32 %v2178_v61, %v709_v17 }
  0x72   :  { %1724 = vmatpush3.bf16.msra.mxu0 %v2287_v15  ;;  %1788 = vmatprep.subr.bf16.mxu1 %v1992_v0  ;;  %v697_v43 = vand.u32 4294901760, %v696_v22  ;;  %v704_v44 = vand.u32 4294901760, %v703_v23  ;;  %v1230_v4 = vand.u32 127, %v1229_v62 }
  0x73   :  { %1725 = vmatprep.subr.bf16.mxu0 %v1992_v0  ;;  %v767_v49 = vand.u32 4294901760, %v766_v47  ;;  %v711_v48 = vand.u32 4294901760, %v710_v25  ;;  %v1819_v25 = vpack.c.bf16 %v702_v45, %v695_v39 }
  0x74   :  { %v1747_v54 = vpack.c.bf16 %v704_v44, %v697_v43  ;;  %vm1231_vm2 = vcmp.lt.s32.totalorder %v1230_v4, 8 }
  0x75   :  { %1790 = vmatpush3.bf16.msra.mxu1 %v1789_v40  ;;  %v2336_v55 = vpack.c.bf16 %v774_v50, %v767_v49  ;;  %v1744_v40 = vpack.c.bf16 %v690_v21, %v683_v20  ;;  %v718_v49 = vand.u32 4294901760, %v717_v27  ;;  %v724_v50 = vsub.f32 %v2192_v3, %v723_v33  ;;  %v1274_v3 = vld [vmem:[%s2498_s4] ss:$0 sm:$0xff]  ;;  %s1995_s4 = smov [#allocation8]  }
  0x76   :  { %1727 = vmatpush3.bf16.msra.mxu0 %v2297_v10  ;;  %1791 = vmatprep.subr.bf16.mxu1 %v1992_v0  ;;  %s1259_s11 = sshll.u32 %s1995_s4, 4  ;;  %s1260_s11 = int_to_ptr.vmem [resolvable:$true] %s1259_s11 }
  0x77   :  { %1728 = vmatprep.subr.bf16.mxu0 %v1992_v0  ;;  %v1750_v58 = vpack.c.bf16 %v718_v49, %v711_v48  ;;  %v725_v59 = vand.u32 4294901760, %v724_v50  ;;  %s1959_s12 = scalar_lea.vmem %s1260_s11, 128  ;;  %p1964_p11 = scmp.lt.s32.totalorder %s1260_s11, %s1260_s11 }
  0x78   :  { %p1960_p10 = scmp.ne.s32.totalorder %s1260_s11, %s1959_s12  ;;  %p1965_p12 = scmp.lt.s32.totalorder %s1959_s12, %s1959_s12 }
  0x7a   :  { %1730 = vmatpush3.bf16.msra.mxu0 %v2305_v13  ;;  %p1966_p13 = por %p1965_p12, %p1964_p11 }
  0x7b   :  { %1731 = vmatprep.subr.bf16.mxu0 %v1992_v0 }
  0x7c   :  { %p1967_p0 = pnand %p1966_p13, %p1960_p10 }
  0x7e   :  { %1733 = vmatpush3.bf16.msra.mxu0 %v2313_v14 }
  0x7f   :  { %1734 = vmatprep.subr.bf16.mxu0 %v1992_v0 }
  0x82   :  { %1736 = vmatpush3.bf16.msra.mxu0 %v2322_v32 }
  0x83   :  { %1737 = vmatprep.subr.bf16.mxu0 %v1992_v0 }
  0x86   :  { %1739 = vmatpush3.bf16.msra.mxu0 %v2327_v41 }
  0x87   :  { %1740 = vmatprep.subr.bf16.mxu0 %v1992_v0 }
  0x8a   :  { %1742 = vmatpush3.bf16.msra.mxu0 %v2332_v42 }
  0x8b   :  { %1743 = vmatprep.subr.bf16.mxu0 %v1992_v0 }
 0x140   :  { %v559_v8 = vpop.f32.mrb[0].mxu0 }
 0x141   :  { %v1863_v9 = vadd.f32 %v1273_v5, %v559_v8  ;;  %v1472_v11 = vpop.f32.mrb[1].mxu0  ;;  %v732_v5 = vand.u32 4294901760, %v731_v53  ;;  %v738_v8 = vsub.f32 %v2214_v12, %v737_v56 }
 0x142   :  { %v751_v11 = vand.u32 4294901760, %v2234_v36 }
 0x143   :  { %v563_v29 = vmax.f32 %v1863_v9, 0.0  ;;  %v745_v9 = vsub.f32 %v2219_v28, %v744_v57  ;;  %v1753_v30 = vpack.c.bf16 %v732_v5, %v725_v59  ;;  %v739_v35 = vand.u32 4294901760, %v738_v8 }
 0x144   :  { %v752_v21 = vsub.f32 %v2234_v36, %v751_v11 }
 0x145   :  { %v2357_v46 = vand.u32 4294901760, %v563_v29  ;;  %v746_v20 = vand.u32 4294901760, %v745_v9 }
 0x146   :  { %v753_v22 = vand.u32 4294901760, %v752_v21 }
 0x147   :  { %v2361_v18 = vsub.f32 %v563_v29, %v2357_v46  ;;  %v758_v29 = vand.u32 4294901760, %v2239_v37  ;;  %v1756_v28 = vpack.c.bf16 %v746_v20, %v739_v35 }
 0x149   :  { %v670_v24 = vand.u32 4294901760, %v2361_v18  ;;  %1576 = vmatmul.mubr.f32.vlgmr.msra.gmra.mrb[0].mxu1 %v2361_v18  ;;  %v759_v12 = vsub.f32 %v2239_v37, %v758_v29  ;;  %v1816_v37 = vpack.c.bf16 %v688_v7, %v681_v6  ;;  %v1831_v52 = vpack.c.bf16 %v758_v29, %v751_v11 }
 0x14a   :  { %1793 = vmatpush3.bf16.msra.mxu1 %v2278_v16  ;;  %1610 = vmatprep.mubr.msk.f32.mxu1 %vm1993_vm0, %v1994_v1 }
 0x14b   :  { %v671_v26 = vsub.f32 %v2361_v18, %v670_v24  ;;  %1794 = vmatprep.subr.bf16.mxu1 %v1992_v0  ;;  %v760_v23 = vand.u32 4294901760, %v759_v12 }
 0x14d   :  { %v672_v47 = vand.u32 4294901760, %v671_v26  ;;  %v1759_v36 = vpack.c.bf16 %v760_v23, %v753_v22 }
 0x14e   :  { %1796 = vmatpush3.bf16.msra.mxu1 %v2287_v15 }
 0x14f   :  { %1506 = vmatmul.mubr.f32.vlgmr.msra.gmra.mrb[2].mxu0 %v672_v47  ;;  %1797 = vmatprep.subr.bf16.mxu1 %v1992_v0 }
 0x150   :  { %1745 = vmatpush3.bf16.msra.mxu0 %v1744_v40  ;;  %1540 = vmatprep.mubr.msk.f32.mxu0 %vm1993_vm0, %v1994_v1 }
 0x151   :  { %1746 = vmatprep.subr.bf16.mxu0 %v1992_v0 }
 0x152   :  { %1799 = vmatpush3.bf16.msra.mxu1 %v2297_v10 }
 0x153   :  { %1800 = vmatprep.subr.bf16.mxu1 %v1992_v0 }
 0x154   :  { %1748 = vmatpush3.bf16.msra.mxu0 %v1747_v54 }
 0x155   :  { %1749 = vmatprep.subr.bf16.mxu0 %v1992_v0 }
 0x156   :  { %1802 = vmatpush3.bf16.msra.mxu1 %v2305_v13 }
 0x157   :  { %1803 = vmatprep.subr.bf16.mxu1 %v1992_v0 }
 0x158   :  { %1751 = vmatpush3.bf16.msra.mxu0 %v1750_v58 }
 0x159   :  { %1752 = vmatprep.subr.bf16.mxu0 %v1992_v0 }
 0x15a   :  { %1805 = vmatpush3.bf16.msra.mxu1 %v2313_v14 }
 0x15b   :  { %1806 = vmatprep.subr.bf16.mxu1 %v1992_v0 }
 0x15c   :  { %1754 = vmatpush3.bf16.msra.mxu0 %v1753_v30 }
 0x15d   :  { %1755 = vmatprep.subr.bf16.mxu0 %v1992_v0 }
 0x15e   :  { %1808 = vmatpush3.bf16.msra.mxu1 %v2322_v32 }
 0x15f   :  { %1809 = vmatprep.subr.bf16.mxu1 %v1992_v0 }
 0x160   :  { %1757 = vmatpush3.bf16.msra.mxu0 %v1756_v28 }
 0x161   :  { %1758 = vmatprep.subr.bf16.mxu0 %v1992_v0 }
 0x162   :  { %1811 = vmatpush3.bf16.msra.mxu1 %v2327_v41 }
 0x163   :  { %1812 = vmatprep.subr.bf16.mxu1 %v1992_v0 }
 0x164   :  { %1760 = vmatpush3.bf16.msra.mxu0 %v1759_v36 }
 0x165   :  { %1761 = vmatprep.subr.bf16.mxu0 %v1992_v0 }
 0x166   :  { %1814 = vmatpush3.bf16.msra.mxu1 %v2332_v42 }
 0x167   :  { %1815 = vmatprep.subr.bf16.mxu1 %v1992_v0 }
 0x168   :  { %1763 = vmatpush3.bf16.msra.mxu0 %v2336_v55 }
 0x169   :  { %1611 = vmatmul.mubr.f32.vlgmr.msra.gmra.mrb[0].mxu1 %v670_v24  ;;  %1764 = vmatprep.subr.bf16.mxu0 %v1992_v0 }
 0x16a   :  { %1817 = vmatpush3.bf16.msra.mxu1 %v1816_v37  ;;  %1645 = vmatprep.mubr.msk.f32.mxu1 %vm1993_vm0, %v1994_v1 }
 0x16b   :  { %1818 = vmatprep.subr.bf16.mxu1 %v1992_v0 }
 0x16c   :  { %1766 = vmatpush3.bf16.msra.mxu0 %v2338_v60 }
 0x16e   :  { %1820 = vmatpush3.bf16.msra.mxu1 %v1819_v25 }
 0x16f   :  { %1541 = vmatmul.mubr.f32.vlgmr.msra.gmra.mrb[2].mxu0 %v2357_v46  ;;  %1821 = vmatprep.subr.bf16.mxu1 %v1992_v0 }
 0x172   :  { %1823 = vmatpush3.bf16.msra.mxu1 %v1822_v31 }
 0x173   :  { %1824 = vmatprep.subr.bf16.mxu1 %v1992_v0 }
 0x176   :  { %1826 = vmatpush3.bf16.msra.mxu1 %v1825_v38 }
 0x177   :  { %1827 = vmatprep.subr.bf16.mxu1 %v1992_v0 }
 0x17a   :  { %1829 = vmatpush3.bf16.msra.mxu1 %v1828_v51 }
 0x17b   :  { %1830 = vmatprep.subr.bf16.mxu1 %v1992_v0 }
 0x17e   :  { %1832 = vmatpush3.bf16.msra.mxu1 %v1831_v52 }
 0x17f   :  { %1833 = vmatprep.subr.bf16.mxu1 %v1992_v0 }
 0x182   :  { %1835 = vmatpush3.bf16.msra.mxu1 %v2340_v63 }
 0x183   :  { %1836 = vmatprep.subr.bf16.mxu1 %v1992_v0 }
 0x186   :  { %1838 = vmatpush3.bf16.msra.mxu1 %v2342_v2 }
 0x187   :  { %1839 = vmatprep.subr.bf16.mxu1 %v1992_v0 }
 0x189   :  { %1646 = vmatmul.mubr.f32.vlgmr.msra.gmra.mrb[0].mxu1 %v2357_v46 }
 0x18a   :  { %1841 = vmatpush3.bf16.msra.mxu1 %v2278_v16  ;;  %1680 = vmatprep.mubr.msk.f32.mxu1 %vm1993_vm0, %v1994_v1 }
 0x18b   :  { %1842 = vmatprep.subr.bf16.mxu1 %v1992_v0 }
 0x18e   :  { %1844 = vmatpush3.bf16.msra.mxu1 %v2287_v15 }
 0x18f   :  { %1845 = vmatprep.subr.bf16.mxu1 %v1992_v0 }
 0x192   :  { %1847 = vmatpush3.bf16.msra.mxu1 %v2297_v10 }
 0x193   :  { %1848 = vmatprep.subr.bf16.mxu1 %v1992_v0 }
 0x196   :  { %1850 = vmatpush3.bf16.msra.mxu1 %v2305_v13 }
 0x197   :  { %1851 = vmatprep.subr.bf16.mxu1 %v1992_v0 }
 0x19a   :  { %1853 = vmatpush3.bf16.msra.mxu1 %v2313_v14 }
 0x19b   :  { %1854 = vmatprep.subr.bf16.mxu1 %v1992_v0 }
 0x19e   :  { %1856 = vmatpush3.bf16.msra.mxu1 %v2322_v32 }
 0x19f   :  { %1857 = vmatprep.subr.bf16.mxu1 %v1992_v0 }
 0x1a2   :  { %1859 = vmatpush3.bf16.msra.mxu1 %v2327_v41 }
 0x1a3   :  { %1860 = vmatprep.subr.bf16.mxu1 %v1992_v0 }
 0x1a6   :  { %1862 = vmatpush3.bf16.msra.mxu1 %v2332_v42 }
 0x1a9   :  { %1681 = vmatmul.mubr.f32.vlgmr.msra.gmra.mrb[0].mxu1 %v2357_v46 }
 0x242   :  { %v825_v1 = vpop.f32.mrb[2].mxu0 }
 0x243   :  { %v1542_v61 = vpop.f32.mrb[3].mxu0  ;;  %v1864_v16 = vadd.f32 %v1274_v3, %v825_v1 }
 0x27c   :  { %v1224_v15 = vpop.f32.mrb[0].mxu1 }
 0x27d   :  { %v1865_v10 = vadd.f32 %v1864_v16, %v1224_v15  ;;  %v1682_v13 = vpop.f32.mrb[1].mxu1 }
 0x27f   :  { %1228 = vst [vmem:[#allocation8] sm:$0xff] %v1865_v10  ;;  %v1232_v14 = vsel %vm1231_vm2, %v1865_v10, -inf }
 0x280   :  { %1233 = vmax.xlane.f32.xlu0 %v1232_v14 }
 0x30d   :  { %v1234_v0 = vpop.xlane.xlu0 %1233 }
 0x30e   :  { %vm1235_vm3 = vcmp.eq.f32.partialorder %v1232_v14, %v1234_v0 }
 0x30f   :  { %v1236_v32 = vsel %vm1235_vm3, %v1230_v4, 128 }
 0x310   :  { %v1238_v41 = vshra.s32 %v1236_v32, 16  ;;  %v1237_v55 = vand.u32 65535, %v1236_v32 }
 0x312   :  { %v1240_v42 = vcvt.s32.f32 %v1238_v41  ;;  %v1239_v63 = vcvt.s32.f32 %v1237_v55 }
 0x314   :  { %1241 = vmin.xlane.f32.xlu0 %v1240_v42 }
 0x3a1   :  { %v1242_v60 = vpop.xlane.xlu0 %1241 }
 0x3a2   :  { %vm1243_vm4 = vcmp.eq.f32.partialorder %v1240_v42, %v1242_v60 }
 0x3a3   :  { %v1244_v2 = vsel %vm1243_vm4, %v1239_v63, inf }
 0x3a4   :  { %1245 = vmin.xlane.f32.xlu1 %v1244_v2 }
 0x3a5   :  { %1970 = shalt.err (!%p1967_p0)
}
 0x3a6   :  { %s1971_s15 = scalar_lea.hbm %s2499_s5, 128 }
 0x3a7   :  { %p1972_p1 = scmp.ne.s32.totalorder %s2499_s5, %s1971_s15  ;;  %p1975_p2 = scmp.lt.u32.totalorder %s1971_s15, %s2499_s5 }
 0x3a9   :  { %p1977_p3 = pnand %p1975_p2, %p1972_p1 }
 0x3ab   :  { %1980 = shalt.err (!%p1977_p3)
}
 0x3ac   :  { %1262 = dma.vmem_to_hbm [thread:$0]  %s1260_s11, 128, %s2499_s5, [#allocation4]   ;;  %v1248_v6 = vcvt.f32.s32 %v1242_v60  ;;  %vm1251_vm5 = vcmask 7168  }
 0x3ae   :  { %v1249_v39 = vshll.u32 %v1248_v6, 16 }
 0x431   :  { %v1246_v7 = vpop.xlane.xlu1 %1245 }
 0x432   :  { %v1247_v45 = vcvt.f32.s32 %v1246_v7 }
 0x434   :  { %v1250_v46 = vadd.s32 %v1249_v39, %v1247_v45 }
 0x436   :  { %1252 = vst.msk [vmem:[%s2500_s6] sm:$0xff] %vm1251_vm5, %v1250_v46 }
 0x437   :  { %1985 = dma.done.wait [#allocation4], 128  }
 0x438   :  { %1986 = vsyncadd [#allocation4], 4294967168 }
 0x439   :  { %1270 = vsyncpa [#allocation3], 1 }
 0x43a   :  { %1271 = vsyncpa [#allocation6], 1 }
 0x43b   :  { %1272 = vsyncpa [#allocation4], 1 }

</bundles_post_ra>
